<compile_context>
chip_gen: v7x
topology: tpu7x:2x2x1
jax: 0.10.0
libtpu: 0.0.40
codegen_flags: <defaults>
</compile_context>

<pallas_src>
import functools

import jax
import jax.numpy as jnp
from jax import lax
from jax.experimental import pallas as pl
from jax.experimental.pallas import tpu as pltpu

_LANE = 128                      # lane width  (last dim of a vreg)
_SUBLANE = 8                     # sublane width (second-to-last dim of a vreg)
_SMALL_PROBLEM_ELEMS = 1 << 17   # below this many x-elements, plain XLA wins


def _round_up(n, m):
    return ((n + m - 1) // m) * m


def _cdiv(a, b):
    return (a + b - 1) // b


def _vmem_capacity_bytes():
    """Physical per-core VMEM (128 MiB v5e/v6e, 64 MiB v7x); safe fallback."""
    cap = 64 * 1024 * 1024
    try:
        info = pltpu.get_tpu_info()
        cap = int(getattr(info, "vmem_capacity_bytes", cap)) or cap
    except Exception:
        pass
    return cap


# ---------------------------------------------------------------------------
# Kernels
# ---------------------------------------------------------------------------

def _linear_kernel(x_ref, w_ref, b_ref, o_ref):
    """Single MXU pass over the full feature dim; f32 acc; fused bias add."""
    acc = jnp.dot(x_ref[...], w_ref[...], preferred_element_type=jnp.float32)
    o_ref[...] = (acc + b_ref[...]).astype(o_ref.dtype)


def _linear_kernel_ktiled(x_ref, w_ref, b_ref, o_ref, acc_ref, *, nk, rem):
    """K-tiled matmul: accumulate partial products in VMEM, bias on last step."""
    k = pl.program_id(1)

    @pl.when(k == 0)
    def _():
        acc_ref[...] = jnp.zeros_like(acc_ref)

    x_val = x_ref[...]
    if rem:
        # The last K block of x extends past D; its out-of-bounds columns hold
        # garbage (the matching W rows are zero-padded, but garbage * 0 can
        # still be NaN), so mask them to zero.
        col = lax.broadcasted_iota(jnp.int32, x_val.shape, 1)
        keep = jnp.logical_or(k < nk - 1, col < rem)
        x_val = jnp.where(keep, x_val, 0)

    acc_ref[...] += jnp.dot(x_val, w_ref[...], preferred_element_type=jnp.float32)

    @pl.when(k == nk - 1)
    def _():
        o_ref[...] = (acc_ref[...] + b_ref[...]).astype(o_ref.dtype)


# ---------------------------------------------------------------------------
# Wrapper
# ---------------------------------------------------------------------------

def logistic_regression_forward(x, W, b, *, block_b=1024, block_k=None,
                                force_pallas=False):
    """Forward pass of LogisticRegression: x @ W + b.

    x: [B, D], W: [D, C], b: [C]  ->  [B, C] float32.

    block_b: target batch tile (rows per grid step).
    block_k: if set, force feature-dim (K) tiling with this tile size;
             otherwise K-tiling is only used when W cannot stay VMEM-resident.
    force_pallas: skip the small-problem XLA fast path (used for testing).

    For a memory-bound large-D run, pass x already in bfloat16 to halve the
    dominant HBM read; no wrapper-side cast is performed here.
    """
    B, D = x.shape
    Dw, C = W.shape
    assert D == Dw, f"feature-dim mismatch: x has {D}, W has {Dw}"
    assert b.shape == (C,), f"bias must have shape ({C},), got {b.shape}"

    # Small-problem fast path: pallas_call launch + layout padding dwarfs the
    # actual work below ~1e5 x elements; plain XLA is faster there.
    if not force_pallas and B * D < _SMALL_PROBLEM_ELEMS:
        out = jnp.dot(x, W.astype(x.dtype),
                      preferred_element_type=jnp.float32) + b.astype(jnp.float32)
        return out.astype(jnp.float32)

    in_dtype = x.dtype                       # no wrapper-side cast (HBM-bound)
    itemsize = jnp.dtype(in_dtype).itemsize
    C_pad = _round_up(C, _LANE)              # lane-dense output stores

    capacity = _vmem_capacity_bytes()
    budget = int(0.75 * capacity)

    # Batch tile: big, 8-aligned, rebalanced so the final (partial) tile is
    # not mostly padding (no round-up of the whole batch).
    tb = max(_SUBLANE, _round_up(min(block_b, B), _SUBLANE))
    nb = _cdiv(B, tb)
    tb = _round_up(_cdiv(B, nb), _SUBLANE)

    def _simple_bytes(t):
        # x / out double-buffered; W counted at 2 buffers so the Buffered(1)
        # fallback also fits; bias negligible.
        return (2 * t * D * itemsize
                + 2 * t * C_pad * 4
                + 2 * D * C_pad * itemsize
                + 2 * C_pad * 4)

    use_ktiled = block_k is not None
    if not use_ktiled:
        while tb > 256 and _simple_bytes(tb) > budget:
            tb = max(256, _round_up(tb // 2, _SUBLANE))
        if _simple_bytes(tb) > budget:
            use_ktiled = True            # huge D*C: W cannot stay resident

    out_shape = jax.ShapeDtypeStruct((B, C_pad), jnp.float32)

    if not use_ktiled:
        nb = _cdiv(B, tb)
        bytes_needed = _simple_bytes(tb)
        vmem_limit = int(min(0.92 * capacity,
                             max(2 * bytes_needed, 32 * 1024 * 1024)))

        # Only the tiny tensors are padded (C -> C_pad); x is untouched.
        Wp = jnp.pad(W.astype(in_dtype), ((0, 0), (0, C_pad - C)))
        bp = jnp.pad(b.astype(jnp.float32), (0, C_pad - C)).reshape(1, C_pad)

        def call(single_buffer_weights):
            w_kwargs = {}
            if single_buffer_weights:
                # W / b block indices are grid-invariant: no double-buffering.
                w_kwargs = dict(pipeline_mode=pl.Buffered(1))
            return pl.pallas_call(
                _linear_kernel,
                out_shape=out_shape,
                grid=(nb,),
                in_specs=[
                    pl.BlockSpec((tb, D), lambda i: (i, 0)),            # x streamed
                    pl.BlockSpec((D, C_pad), lambda i: (0, 0), **w_kwargs),
                    pl.BlockSpec((1, C_pad), lambda i: (0, 0), **w_kwargs),
                ],
                out_specs=pl.BlockSpec((tb, C_pad), lambda i: (i, 0)),
                compiler_params=pltpu.CompilerParams(
                    dimension_semantics=("parallel",),
                    vmem_limit_bytes=vmem_limit,
                ),
            )(x, Wp, bp)

        try:
            out = call(True)
        except Exception:
            out = call(False)            # fall back to default double-buffering

    else:
        tk = _round_up(block_k if block_k is not None else 512, _LANE)
        tk = min(tk, _round_up(D, _LANE))

        def _ktiled_bytes(t, kk):
            return (2 * t * kk * itemsize         # x tiles
                    + 2 * kk * C_pad * itemsize   # W tiles (change per k step)
                    + 2 * t * C_pad * 4           # out tiles
                    + t * C_pad * 4               # f32 accumulator scratch
                    + 2 * C_pad * 4)              # bias

        while tb > 256 and _ktiled_bytes(tb, tk) > budget:
            tb = max(256, _round_up(tb // 2, _SUBLANE))
        while tk > _LANE and _ktiled_bytes(tb, tk) > budget:
            tk = max(_LANE, _round_up(tk // 2, _LANE))
        while tb > _SUBLANE and _ktiled_bytes(tb, tk) > budget:   # last resort
            tb = max(_SUBLANE, _round_up(tb // 2, _SUBLANE))

        nb = _cdiv(B, tb)
        nk = _cdiv(D, tk)
        d_pad = nk * tk
        rem = D % tk
        bytes_needed = _ktiled_bytes(tb, tk)
        vmem_limit = int(min(0.92 * capacity,
                             max(2 * bytes_needed, 32 * 1024 * 1024)))

        # Only W (tiny relative to x) is padded along D; x is passed as-is and
        # the kernel masks the partial final K block.
        Wp = jnp.pad(W.astype(in_dtype), ((0, d_pad - D), (0, C_pad - C)))
        bp = jnp.pad(b.astype(jnp.float32), (0, C_pad - C)).reshape(1, C_pad)

        kernel = functools.partial(_linear_kernel_ktiled, nk=nk, rem=rem)
        out = pl.pallas_call(
            kernel,
            out_shape=out_shape,
            grid=(nb, nk),
            in_specs=[
                pl.BlockSpec((tb, tk), lambda i, k: (i, k)),        # x
                pl.BlockSpec((tk, C_pad), lambda i, k: (k, 0)),     # W
                pl.BlockSpec((1, C_pad), lambda i, k: (0, 0)),      # b
            ],
            out_specs=pl.BlockSpec((tb, C_pad), lambda i, k: (i, 0)),
            scratch_shapes=[pltpu.VMEM((tb, C_pad), jnp.float32)],
            compiler_params=pltpu.CompilerParams(
                dimension_semantics=("parallel", "arbitrary"),
                vmem_limit_bytes=vmem_limit,
            ),
        )(x, Wp, bp)

    # Only the lane padding (if any) is trimmed; no batch-dim slice remains.
    return out if C_pad == C else out[:, :C]


if __name__ == "__main__":
    key = jax.random.PRNGKey(0)
    kx, kw, kx2, kw2 = jax.random.split(key, 4)

    # Shapes mirroring the module: LogisticRegression(input_dim=32, num_class=16)
    batch, input_dim, num_class = 8, 32, 16

    # Deterministic parameter init mirroring __init__:
    #   W = randn(input_dim, num_class), b = zeros(num_class)
    W = jax.random.normal(kw, (input_dim, num_class), dtype=jnp.float32)
    b = jnp.zeros((num_class,), dtype=jnp.float32)
    x = jax.random.normal(kx, (batch, input_dim), dtype=jnp.float32)

    ref = x @ W + b

    # 1) Default call: small-problem XLA fast path.
    out_fast = jax.block_until_ready(logistic_regression_forward(x, W, b))
    assert out_fast.shape == (batch, num_class)
    assert jnp.allclose(out_fast, ref, atol=1e-5, rtol=1e-5)

    # 2) Single-pass Pallas kernel (W resident, batch-tiled grid).
    out_pallas = jax.block_until_ready(
        logistic_regression_forward(x, W, b, force_pallas=True))
    assert out_pallas.shape == (batch, num_class)
    assert jnp.allclose(out_pallas, ref, atol=1e-5, rtol=1e-5)

    # 3) K-tiled Pallas kernel (VMEM accumulator + partial-final-K masking) on
    #    a deliberately misaligned shape.
    batch2, input_dim2, num_class2 = 24, 300, 10
    x2 = jax.random.normal(kx2, (batch2, input_dim2), dtype=jnp.float32)
    W2 = jax.random.normal(kw2, (input_dim2, num_class2), dtype=jnp.float32)
    b2 = 0.1 * jnp.arange(num_class2, dtype=jnp.float32)
    ref2 = x2 @ W2 + b2
    out_ktiled = jax.block_until_ready(
        logistic_regression_forward(x2, W2, b2, force_pallas=True, block_k=128))
    assert out_ktiled.shape == (batch2, num_class2)
    assert jnp.allclose(out_ktiled, ref2, atol=1e-4, rtol=1e-4)

    print("KERNEL_OK")
</pallas_src>

<mosaic_0001>
module attributes {stable_mosaic.version = 11 : i64} {
  func.func @_linear_kernel(%arg0: i32, %arg1: memref<8x32xf32, #tpu.memory_space<vmem>>, %arg2: memref<32x128xf32, #tpu.memory_space<vmem>>, %arg3: memref<1x128xf32, #tpu.memory_space<vmem>>, %arg4: memref<8x128xf32, #tpu.memory_space<vmem>>) attributes {dimension_semantics = [#tpu.dimension_semantics<parallel>], iteration_bounds = array<i64: 1>, scalar_prefetch = 0 : i64, scratch_operands = 0 : i64, tpu.core_type = #tpu.core_type<tc>, window_params = [{transform_indices = @transform_0, window_bounds = array<i64: 8, 32>}, {pipeline_mode = #tpu.pipeline_mode<synchronous>, transform_indices = @transform_1, window_bounds = array<i64: 32, 128>}, {pipeline_mode = #tpu.pipeline_mode<synchronous>, transform_indices = @transform_2, window_bounds = array<i64: 1, 128>}, {transform_indices = @transform_3, window_bounds = array<i64: 8, 128>}]} {
    %c0 = arith.constant 0 : index
    %c0_0 = arith.constant 0 : index
    %0 = vector.load %arg1[%c0, %c0_0] : memref<8x32xf32, #tpu.memory_space<vmem>>, vector<8x32xf32>
    %c0_1 = arith.constant 0 : index
    %c0_2 = arith.constant 0 : index
    %1 = vector.load %arg2[%c0_1, %c0_2] : memref<32x128xf32, #tpu.memory_space<vmem>>, vector<32x128xf32>
    %cst = arith.constant dense<0.000000e+00> : vector<8x128xf32>
    %2 = tpu.matmul %0, %1, %cst {dimension_numbers = #tpu.dot_dimension_numbers<[1], [0], [0], [1], [0, 0, 1, 1], [], []>} : vector<8x32xf32>, vector<32x128xf32>, vector<8x128xf32> -> vector<8x128xf32>
    %c0_3 = arith.constant 0 : index
    %c0_4 = arith.constant 0 : index
    %3 = vector.load %arg3[%c0_3, %c0_4] : memref<1x128xf32, #tpu.memory_space<vmem>>, vector<1x128xf32>
    %4 = vector.broadcast %3 : vector<1x128xf32> to vector<8x128xf32>
    %5 = arith.addf %2, %4 : vector<8x128xf32>
    %c0_5 = arith.constant 0 : index
    %c0_6 = arith.constant 0 : index
    %6 = vector.load %arg4[%c0_5, %c0_6] : memref<8x128xf32, #tpu.memory_space<vmem>>, vector<8x128xf32>
    tpu.vector_store %arg4[%c0_5, %c0_6], %5 {strides = array<i32>} : memref<8x128xf32, #tpu.memory_space<vmem>>, vector<8x128xf32>,
    return
  }
  func.func @transform_0(%arg0: i32) -> (i32, i32) {
    %c0_i32 = arith.constant 0 : i32
    %c0_i32_0 = arith.constant 0 : i32
    return %arg0, %c0_i32 : i32, i32
  }
  func.func @transform_1(%arg0: i32) -> (i32, i32) {
    %c0_i32 = arith.constant 0 : i32
    %c0_i32_0 = arith.constant 0 : i32
    %c0_i32_1 = arith.constant 0 : i32
    return %c0_i32, %c0_i32_0 : i32, i32
  }
  func.func @transform_2(%arg0: i32) -> (i32, i32) {
    %c0_i32 = arith.constant 0 : i32
    %c0_i32_0 = arith.constant 0 : i32
    %c0_i32_1 = arith.constant 0 : i32
    return %c0_i32, %c0_i32_0 : i32, i32
  }
  func.func @transform_3(%arg0: i32) -> (i32, i32) {
    %c0_i32 = arith.constant 0 : i32
    %c0_i32_0 = arith.constant 0 : i32
    return %arg0, %c0_i32 : i32, i32
  }
}

module attributes {stable_mosaic.version = 11 : i64} {
  func.func @_linear_kernel(%arg0: i32, %arg1: memref<8x32xf32, #tpu.memory_space<vmem>>, %arg2: memref<32x128xf32, #tpu.memory_space<vmem>>, %arg3: memref<1x128xf32, #tpu.memory_space<vmem>>, %arg4: memref<8x128xf32, #tpu.memory_space<vmem>>) attributes {dimension_semantics = [#tpu.dimension_semantics<parallel>], iteration_bounds = array<i64: 1>, scalar_prefetch = 0 : i64, scratch_operands = 0 : i64, tpu.core_type = #tpu.core_type<tc>, window_params = [{transform_indices = @transform_0, window_bounds = array<i64: 8, 32>}, {pipeline_mode = #tpu.pipeline_mode<synchronous>, transform_indices = @transform_1, window_bounds = array<i64: 32, 128>}, {pipeline_mode = #tpu.pipeline_mode<synchronous>, transform_indices = @transform_2, window_bounds = array<i64: 1, 128>}, {transform_indices = @transform_3, window_bounds = array<i64: 8, 128>}]} {
    %c0 = arith.constant 0 : index
    %c0_0 = arith.constant 0 : index
    %0 = vector.load %arg1[%c0, %c0_0] : memref<8x32xf32, #tpu.memory_space<vmem>>, vector<8x32xf32>
    %c0_1 = arith.constant 0 : index
    %c0_2 = arith.constant 0 : index
    %1 = vector.load %arg2[%c0_1, %c0_2] : memref<32x128xf32, #tpu.memory_space<vmem>>, vector<32x128xf32>
    %cst = arith.constant dense<0.000000e+00> : vector<8x128xf32>
    %2 = tpu.matmul %0, %1, %cst {dimension_numbers = #tpu.dot_dimension_numbers<[1], [0], [0], [1], [0, 0, 1, 1], [], []>} : vector<8x32xf32>, vector<32x128xf32>, vector<8x128xf32> -> vector<8x128xf32>
    %c0_3 = arith.constant 0 : index
    %c0_4 = arith.constant 0 : index
    %3 = vector.load %arg3[%c0_3, %c0_4] : memref<1x128xf32, #tpu.memory_space<vmem>>, vector<1x128xf32>
    %4 = vector.broadcast %3 : vector<1x128xf32> to vector<8x128xf32>
    %5 = arith.addf %2, %4 : vector<8x128xf32>
    %c0_5 = arith.constant 0 : index
    %c0_6 = arith.constant 0 : index
    %6 = vector.load %arg4[%c0_5, %c0_6] : memref<8x128xf32, #tpu.memory_space<vmem>>, vector<8x128xf32>
    tpu.vector_store %arg4[%c0_5, %c0_6], %5 {strides = array<i32>} : memref<8x128xf32, #tpu.memory_space<vmem>>, vector<8x128xf32>,
    return
  }
  func.func @transform_0(%arg0: i32) -> (i32, i32) {
    %c0_i32 = arith.constant 0 : i32
    %c0_i32_0 = arith.constant 0 : i32
    return %arg0, %c0_i32 : i32, i32
  }
  func.func @transform_1(%arg0: i32) -> (i32, i32) {
    %c0_i32 = arith.constant 0 : i32
    %c0_i32_0 = arith.constant 0 : i32
    %c0_i32_1 = arith.constant 0 : i32
    return %c0_i32, %c0_i32_0 : i32, i32
  }
  func.func @transform_2(%arg0: i32) -> (i32, i32) {
    %c0_i32 = arith.constant 0 : i32
    %c0_i32_0 = arith.constant 0 : i32
    %c0_i32_1 = arith.constant 0 : i32
    return %c0_i32, %c0_i32_0 : i32, i32
  }
  func.func @transform_3(%arg0: i32) -> (i32, i32) {
    %c0_i32 = arith.constant 0 : i32
    %c0_i32_0 = arith.constant 0 : i32
    return %arg0, %c0_i32 : i32, i32
  }
}

</mosaic_0001>

<bundles_post_ra>
// kernel: tpu_custom_call.1
= control target key start
LH: loop header
LB: loop body
LE: loop exit
PB: predicated region body
PF: predicated region fallthrough
CT: control target
= control target key end

     0   :  { %8 = vsyncpa [#allocation3], 0  ;;  %s322_s0 = inlined_call_operand.hbm [shape: f32[8,32], index: 0, kind: input, shape index: {}]   ;;  %s323_s1 = inlined_call_operand.hbm [shape: f32[32,128], index: 1, kind: input, shape index: {}]   ;;  %s324_s2 = inlined_call_operand.vmem [shape: f32[1,128], index: 2, kind: input, shape index: {}]   ;;  %s325_s3 = inlined_call_operand.hbm [shape: f32[8,128], index: 3, kind: output, shape index: {}]  }
   0x1   :  { %9 = vsyncpa [#allocation6], 0 }
   0x2   :  { %10 = vsyncpa [#allocation4], 0  ;;  %s248_s12 = smov [#allocation2]   ;;  %s249_s14 = smov [#allocation5]  }
   0x3   :  { %s17_s13 = sshll.u32 %s248_s12, 4  ;;  %s26_s15 = sshll.u32 %s249_s14, 4  ;;  %s18_s13 = int_to_ptr.vmem [resolvable:$true] %s17_s13  ;;  %s276_s15 = int_to_ptr.vmem [resolvable:$true] %s26_s15 }
   0x4   :  { %s176_s18 = scalar_lea.hbm %s322_s0, 128 }
   0x5   :  { %p177_p0 = scmp.ne.s32.totalorder %s322_s0, %s176_s18  ;;  %p180_p1 = scmp.lt.u32.totalorder %s176_s18, %s322_s0 }
   0x7   :  { %p182_p2 = pnand %p180_p1, %p177_p0 }
   0x9   :  { %185 = shalt.err (!%p182_p2)
}
   0xa   :  { %s186_s23 = scalar_lea.vmem %s18_s13, 128  ;;  %p191_p4 = scmp.lt.s32.totalorder %s18_s13, %s18_s13 }
   0xb   :  { %p187_p3 = scmp.ne.s32.totalorder %s18_s13, %s186_s23  ;;  %p192_p5 = scmp.lt.s32.totalorder %s186_s23, %s186_s23 }
   0xd   :  { %p193_p6 = por %p192_p5, %p191_p4 }
   0xf   :  { %p194_p7 = pnand %p193_p6, %p187_p3 }
  0x11   :  { %197 = shalt.err (!%p194_p7)
}
  0x12   :  { %20 = dma.hbm_to_vmem [thread:$0]  %s322_s0, 128, %s18_s13, [#allocation3]  }
  0x13   :  { %s198_s28 = scalar_lea.hbm %s323_s1, 512 }
  0x14   :  { %p199_p8 = scmp.ne.s32.totalorder %s323_s1, %s198_s28  ;;  %p202_p9 = scmp.lt.u32.totalorder %s198_s28, %s323_s1 }
  0x16   :  { %p204_p10 = pnand %p202_p9, %p199_p8 }
  0x18   :  { %207 = shalt.err (!%p204_p10)
}
  0x19   :  { %s208_s6 = scalar_lea.vmem %s276_s15, 512  ;;  %p213_p12 = scmp.lt.s32.totalorder %s276_s15, %s276_s15 }
  0x1a   :  { %p209_p11 = scmp.ne.s32.totalorder %s276_s15, %s208_s6  ;;  %p214_p13 = scmp.lt.s32.totalorder %s208_s6, %s208_s6 }
  0x1c   :  { %p215_p0 = por %p214_p13, %p213_p12 }
  0x1e   :  { %p216_p1 = pnand %p215_p0, %p209_p11 }
  0x20   :  { %219 = shalt.err (!%p216_p1)
}
  0x21   :  { %s250_s0 = smov 128   ;;  %s251_s7 = smov 8  }
  0x22   :  { %32 = dma.hbm_to_vmem [thread:$0]  %s323_s1, 512, %s276_s15, [#allocation6], %s250_s0, %s250_s0, %s251_s7  }
  0x23   :  { %242 = dma.done.wait [#allocation3], 128  }
  0x24   :  { %243 = vsyncadd [#allocation3], 4294967168 }
  0x25   :  { %244 = dma.done.wait [#allocation6], 512  }
  0x26   :  { %245 = vsyncadd [#allocation6], 4294966784  ;;  %v252_v0 = vmov 0.0|0.0   ;;  %vm253_vm0 = vmmov 0   ;;  %v254_v1 = vmov 0.0   ;;  %v42_v2 = vld [vmem:[#allocation5] sm:$0xff] }
  0x27   :  { %162 = vmatprep.subr.bf16.mxu0 %v252_v0  ;;  %159 = vmatprep.mubr.msk.f32.mxu0 %vm253_vm0, %v254_v1  ;;  %v43_v3 = vld [vmem:[#allocation5 + $0x8] sm:$0xff]  ;;  %v44_v4 = vld [vmem:[#allocation5 + $0x10] sm:$0xff]  ;;  %v45_v6 = vld [vmem:[#allocation5 + $0x18] sm:$0xff]  ;;  %vm53_vm1 = vcmask 261120   ;;  %s255_s11 = smov [#allocation7]  }
  0x28   :  { %v163_v5 = vpack.c.bf16 %v43_v3, %v42_v2  ;;  %v166_v7 = vpack.c.bf16 %v45_v6, %v44_v4  ;;  %v41_v8 = vld [vmem:[#allocation2] sm:$0xff]  ;;  %s134_s12 = sshll.u32 %s255_s11, 4  ;;  %s135_s12 = int_to_ptr.vmem [resolvable:$true] %s134_s12 }
  0x29   :  { %v144_v9 = vld [vmem:[%s324_s2] ss:$0 sm:$0xff]  ;;  %s220_s13 = scalar_lea.vmem %s135_s12, 128  ;;  %p225_p3 = scmp.lt.s32.totalorder %s135_s12, %s135_s12 }
  0x2a   :  { %164 = vmatpush3.bf16.msra.mxu0 %v163_v5  ;;  %p221_p2 = scmp.ne.s32.totalorder %s135_s12, %s220_s13  ;;  %p226_p4 = scmp.lt.s32.totalorder %s220_s13, %s220_s13 }
  0x2b   :  { %165 = vmatprep.subr.bf16.mxu0 %v252_v0 }
  0x2c   :  { %p227_p5 = por %p226_p4, %p225_p3 }
  0x2e   :  { %167 = vmatpush3.bf16.msra.mxu0 %v166_v7  ;;  %p228_p6 = pnand %p227_p5, %p221_p2 }
  0x31   :  { %160 = vmatmul.mubr.msk.f32.vlgmr.msra.gmra.mrb[0].mxu0 %vm53_vm1, %v41_v8 }
 0x104   :  { %v123_v10 = vpop.f32.mrb[0].mxu0 }
 0x105   :  { %v124_v11 = vadd.f32 %v144_v9, %v123_v10  ;;  %v161_v12 = vpop.f32.mrb[1].mxu0 }
 0x107   :  { %127 = vst [vmem:[#allocation7] sm:$0xff] %v124_v11 }
 0x108   :  { %231 = shalt.err (!%p228_p6)
}
 0x109   :  { %s232_s16 = scalar_lea.hbm %s325_s3, 128 }
 0x10a   :  { %p233_p7 = scmp.ne.s32.totalorder %s325_s3, %s232_s16  ;;  %p236_p8 = scmp.lt.u32.totalorder %s232_s16, %s325_s3 }
 0x10c   :  { %p238_p9 = pnand %p236_p8, %p233_p7 }
 0x10e   :  { %241 = shalt.err (!%p238_p9)
}
 0x10f   :  { %137 = dma.vmem_to_hbm [thread:$0]  %s135_s12, 128, %s325_s3, [#allocation4]  }
 0x110   :  { %246 = dma.done.wait [#allocation4], 128  }
 0x111   :  { %247 = vsyncadd [#allocation4], 4294967168 }
 0x112   :  { %141 = vsyncpa [#allocation3], 1 }
 0x113   :  { %142 = vsyncpa [#allocation6], 1 }
 0x114   :  { %143 = vsyncpa [#allocation4], 1 }

// kernel: tpu_custom_call.1
= control target key start
LH: loop header
LB: loop body
LE: loop exit
PB: predicated region body
PF: predicated region fallthrough
CT: control target
= control target key end

     0   :  { %8 = vsyncpa [#allocation3], 0  ;;  %s322_s0 = inlined_call_operand.hbm [shape: f32[8,32], index: 0, kind: input, shape index: {}]   ;;  %s323_s1 = inlined_call_operand.hbm [shape: f32[32,128], index: 1, kind: input, shape index: {}]   ;;  %s324_s2 = inlined_call_operand.vmem [shape: f32[1,128], index: 2, kind: input, shape index: {}]   ;;  %s325_s3 = inlined_call_operand.hbm [shape: f32[8,128], index: 3, kind: output, shape index: {}]  }
   0x1   :  { %9 = vsyncpa [#allocation6], 0 }
   0x2   :  { %10 = vsyncpa [#allocation4], 0  ;;  %s248_s12 = smov [#allocation2]   ;;  %s249_s14 = smov [#allocation5]  }
   0x3   :  { %s17_s13 = sshll.u32 %s248_s12, 4  ;;  %s26_s15 = sshll.u32 %s249_s14, 4  ;;  %s18_s13 = int_to_ptr.vmem [resolvable:$true] %s17_s13  ;;  %s276_s15 = int_to_ptr.vmem [resolvable:$true] %s26_s15 }
   0x4   :  { %s176_s18 = scalar_lea.hbm %s322_s0, 128 }
   0x5   :  { %p177_p0 = scmp.ne.s32.totalorder %s322_s0, %s176_s18  ;;  %p180_p1 = scmp.lt.u32.totalorder %s176_s18, %s322_s0 }
   0x7   :  { %p182_p2 = pnand %p180_p1, %p177_p0 }
   0x9   :  { %185 = shalt.err (!%p182_p2)
}
   0xa   :  { %s186_s23 = scalar_lea.vmem %s18_s13, 128  ;;  %p191_p4 = scmp.lt.s32.totalorder %s18_s13, %s18_s13 }
   0xb   :  { %p187_p3 = scmp.ne.s32.totalorder %s18_s13, %s186_s23  ;;  %p192_p5 = scmp.lt.s32.totalorder %s186_s23, %s186_s23 }
   0xd   :  { %p193_p6 = por %p192_p5, %p191_p4 }
   0xf   :  { %p194_p7 = pnand %p193_p6, %p187_p3 }
  0x11   :  { %197 = shalt.err (!%p194_p7)
}
  0x12   :  { %20 = dma.hbm_to_vmem [thread:$0]  %s322_s0, 128, %s18_s13, [#allocation3]  }
  0x13   :  { %s198_s28 = scalar_lea.hbm %s323_s1, 512 }
  0x14   :  { %p199_p8 = scmp.ne.s32.totalorder %s323_s1, %s198_s28  ;;  %p202_p9 = scmp.lt.u32.totalorder %s198_s28, %s323_s1 }
  0x16   :  { %p204_p10 = pnand %p202_p9, %p199_p8 }
  0x18   :  { %207 = shalt.err (!%p204_p10)
}
  0x19   :  { %s208_s6 = scalar_lea.vmem %s276_s15, 512  ;;  %p213_p12 = scmp.lt.s32.totalorder %s276_s15, %s276_s15 }
  0x1a   :  { %p209_p11 = scmp.ne.s32.totalorder %s276_s15, %s208_s6  ;;  %p214_p13 = scmp.lt.s32.totalorder %s208_s6, %s208_s6 }
  0x1c   :  { %p215_p0 = por %p214_p13, %p213_p12 }
  0x1e   :  { %p216_p1 = pnand %p215_p0, %p209_p11 }
  0x20   :  { %219 = shalt.err (!%p216_p1)
}
  0x21   :  { %s250_s0 = smov 128   ;;  %s251_s7 = smov 8  }
  0x22   :  { %32 = dma.hbm_to_vmem [thread:$0]  %s323_s1, 512, %s276_s15, [#allocation6], %s250_s0, %s250_s0, %s251_s7  }
  0x23   :  { %242 = dma.done.wait [#allocation3], 128  }
  0x24   :  { %243 = vsyncadd [#allocation3], 4294967168 }
  0x25   :  { %244 = dma.done.wait [#allocation6], 512  }
  0x26   :  { %245 = vsyncadd [#allocation6], 4294966784  ;;  %v252_v0 = vmov 0.0|0.0   ;;  %vm253_vm0 = vmmov 0   ;;  %v254_v1 = vmov 0.0   ;;  %v42_v2 = vld [vmem:[#allocation5] sm:$0xff] }
  0x27   :  { %162 = vmatprep.subr.bf16.mxu0 %v252_v0  ;;  %159 = vmatprep.mubr.msk.f32.mxu0 %vm253_vm0, %v254_v1  ;;  %v43_v3 = vld [vmem:[#allocation5 + $0x8] sm:$0xff]  ;;  %v44_v4 = vld [vmem:[#allocation5 + $0x10] sm:$0xff]  ;;  %v45_v6 = vld [vmem:[#allocation5 + $0x18] sm:$0xff]  ;;  %vm53_vm1 = vcmask 261120   ;;  %s255_s11 = smov [#allocation7]  }
  0x28   :  { %v163_v5 = vpack.c.bf16 %v43_v3, %v42_v2  ;;  %v166_v7 = vpack.c.bf16 %v45_v6, %v44_v4  ;;  %v41_v8 = vld [vmem:[#allocation2] sm:$0xff]  ;;  %s134_s12 = sshll.u32 %s255_s11, 4  ;;  %s135_s12 = int_to_ptr.vmem [resolvable:$true] %s134_s12 }
  0x29   :  { %v144_v9 = vld [vmem:[%s324_s2] ss:$0 sm:$0xff]  ;;  %s220_s13 = scalar_lea.vmem %s135_s12, 128  ;;  %p225_p3 = scmp.lt.s32.totalorder %s135_s12, %s135_s12 }
  0x2a   :  { %164 = vmatpush3.bf16.msra.mxu0 %v163_v5  ;;  %p221_p2 = scmp.ne.s32.totalorder %s135_s12, %s220_s13  ;;  %p226_p4 = scmp.lt.s32.totalorder %s220_s13, %s220_s13 }
  0x2b   :  { %165 = vmatprep.subr.bf16.mxu0 %v252_v0 }
  0x2c   :  { %p227_p5 = por %p226_p4, %p225_p3 }
  0x2e   :  { %167 = vmatpush3.bf16.msra.mxu0 %v166_v7  ;;  %p228_p6 = pnand %p227_p5, %p221_p2 }
  0x31   :  { %160 = vmatmul.mubr.msk.f32.vlgmr.msra.gmra.mrb[0].mxu0 %vm53_vm1, %v41_v8 }
 0x104   :  { %v123_v10 = vpop.f32.mrb[0].mxu0 }
 0x105   :  { %v124_v11 = vadd.f32 %v144_v9, %v123_v10  ;;  %v161_v12 = vpop.f32.mrb[1].mxu0 }
 0x107   :  { %127 = vst [vmem:[#allocation7] sm:$0xff] %v124_v11 }
 0x108   :  { %231 = shalt.err (!%p228_p6)
}
 0x109   :  { %s232_s16 = scalar_lea.hbm %s325_s3, 128 }
 0x10a   :  { %p233_p7 = scmp.ne.s32.totalorder %s325_s3, %s232_s16  ;;  %p236_p8 = scmp.lt.u32.totalorder %s232_s16, %s325_s3 }
 0x10c   :  { %p238_p9 = pnand %p236_p8, %p233_p7 }
 0x10e   :  { %241 = shalt.err (!%p238_p9)
}
 0x10f   :  { %137 = dma.vmem_to_hbm [thread:$0]  %s135_s12, 128, %s325_s3, [#allocation4]  }
 0x110   :  { %246 = dma.done.wait [#allocation4], 128  }
 0x111   :  { %247 = vsyncadd [#allocation4], 4294967168 }
 0x112   :  { %141 = vsyncpa [#allocation3], 1 }
 0x113   :  { %142 = vsyncpa [#allocation6], 1 }
 0x114   :  { %143 = vsyncpa [#allocation4], 1 }

</bundles_post_ra>
